<compile_context>
chip_gen: v6e
topology: v6e:2x2x1
jax: 0.10.0
libtpu: 0.0.40
codegen_flags: <defaults>
</compile_context>

<pallas_src>
import functools

import jax
import jax.numpy as jnp
from jax.experimental import pallas as pl
from jax.experimental.pallas import tpu as pltpu

EPS = 1e-6  # LayerNorm eps (Annotated-Transformer style: eps added to std)

try:
    _VMEM_CAP = pltpu.get_tpu_info().vmem_capacity_bytes
except Exception:  # pragma: no cover - conservative fallback
    _VMEM_CAP = 128 * 1024 * 1024
_VMEM_LIMIT = int(_VMEM_CAP * 0.8)

# Flipped off at runtime if pipeline_mode=pl.Buffered(1) is rejected.
_SINGLE_BUFFER_OK = [True]


# --------------------------------------------------------------------------
# helpers
# --------------------------------------------------------------------------
def _layer_norm(h, g, b):
    # a_2 * (x - mean) / (std + eps) + b_2 ; torch.std is unbiased (D - 1).
    mu = jnp.mean(h, axis=-1, keepdims=True)
    d = h - mu
    var = jnp.sum(d * d, axis=-1, keepdims=True) * (1.0 / (h.shape[-1] - 1))
    return g * (d / (jnp.sqrt(var) + EPS)) + b


def _wspec(shape, single):
    """BlockSpec for a grid-invariant operand (weights / biases / LN params)."""
    n = len(shape)
    idx = lambda *_, _n=n: (0,) * _n
    if single:
        return pl.BlockSpec(shape, idx, pipeline_mode=pl.Buffered(1))
    return pl.BlockSpec(shape, idx)


def _pick_tile(n, target):
    """Largest divisor of n <= target, preferring 256-, then 128-, then 8-aligned."""
    if n <= target:
        return n
    for align in (256, 128, 8):
        t = (target // align) * align
        while t >= align:
            if n % t == 0:
                return t
            t -= align
    return n


def _tile_candidates(s):
    cands = [t for t in (2048, 1024, 512, 256, 128) if s % t == 0]
    cands.append(s)
    return sorted(set(cands), reverse=True)


def _estimate_vmem(d, dff, n_heads, tq, tkv):
    bf, f4 = 2, 4
    dk = d // n_heads
    weights = (3 * d * d + d * d + 2 * d * dff) * bf + (3 * d + 2 * d + dff + 6 * d) * f4
    streams = 2 * (tq * d * f4 + tq * d * bf + 2 * tkv * d * bf + tq * tkv * bf)
    out = 2 * tq * d * f4
    scratch = n_heads * tq * (2 + dk) * f4
    return weights + streams + out + scratch


def _choose_tiles(s, d, dff, n_heads, limit):
    budget = int(limit * 0.8)
    cands = _tile_candidates(s)
    q_cands = [t for t in cands if t <= 512] or [min(cands)]
    for tq in q_cands:          # largest q tile first
        for tkv in cands:       # prefer resident K/V (tkv == S) when it fits
            if _estimate_vmem(d, dff, n_heads, tq, tkv) <= budget:
                return tq, tkv
    return min(cands), min(cands)


# --------------------------------------------------------------------------
# Kernel 1: pre-norm + fused QKV projection     out: qkv [B, S, 3D] (bf16)
#           (1/sqrt(dk) is pre-folded into the Q columns of wqkv / bqkv)
# --------------------------------------------------------------------------
def ln_qkv_kernel(x_ref, g_ref, b_ref, wqkv_ref, bqkv_ref, o_ref):
    h = _layer_norm(x_ref[0].astype(jnp.float32), g_ref[0], b_ref[0])
    qkv = jnp.dot(h.astype(jnp.bfloat16), wqkv_ref[...],
                  preferred_element_type=jnp.float32) + bqkv_ref[0]
    o_ref[0] = qkv.astype(o_ref.dtype)


def _ln_qkv_call(x, g, b, wqkv, bqkv, *, ts, single):
    B, S, D = x.shape
    D3 = wqkv.shape[1]
    return pl.pallas_call(
        ln_qkv_kernel,
        out_shape=jax.ShapeDtypeStruct((B, S, D3), jnp.bfloat16),
        grid=(B, S // ts),
        in_specs=[pl.BlockSpec((1, ts, D), lambda bi, si: (bi, si, 0)),
                  _wspec(g.shape, single), _wspec(b.shape, single),
                  _wspec(wqkv.shape, single), _wspec(bqkv.shape, single)],
        out_specs=pl.BlockSpec((1, ts, D3), lambda bi, si: (bi, si, 0)),
        compiler_params=pltpu.CompilerParams(
            dimension_semantics=("parallel", "parallel"),
            vmem_limit_bytes=_VMEM_LIMIT),
    )(x, g, b, wqkv, bqkv)


def ln_qkv(x, g, b, wqkv, bqkv, *, ts):
    if _SINGLE_BUFFER_OK[0]:
        try:
            return _ln_qkv_call(x, g, b, wqkv, bqkv, ts=ts, single=True)
        except Exception:
            _SINGLE_BUFFER_OK[0] = False
    return _ln_qkv_call(x, g, b, wqkv, bqkv, ts=ts, single=False)


# --------------------------------------------------------------------------
# Kernel 2: masked MHA (flash-style over KV tiles) + out-proj + residual
#           + pre-norm FFN + residual, optionally fused final LayerNorm.
#           Grid: (batch, q-tile, kv-tile); kv-tile is the reduction axis.
# --------------------------------------------------------------------------
def attn_ffn_kernel(x_ref, q_ref, k_ref, v_ref, bias_ref,
                    wo_ref, bo_ref, ln2g_ref, ln2b_ref,
                    w1_ref, b1_ref, w2_ref, b2_ref,
                    lnfg_ref, lnfb_ref,
                    o_ref, m_sc, l_sc, acc_sc,
                    *, n_heads, apply_final_norm):
    ki = pl.program_id(2)
    nk = pl.num_programs(2)
    dk = q_ref.shape[-1] // n_heads

    @pl.when(ki == 0)
    def _():
        m_sc[...] = jnp.full(m_sc.shape, -1e30, m_sc.dtype)
        l_sc[...] = jnp.zeros(l_sc.shape, l_sc.dtype)
        acc_sc[...] = jnp.zeros(acc_sc.shape, acc_sc.dtype)

    q = q_ref[0]                                    # (tq,  D) bf16, pre-scaled
    k = k_ref[0]                                    # (tkv, D) bf16
    v = v_ref[0]                                    # (tkv, D) bf16
    bias = bias_ref[0].astype(jnp.float32)          # (tq, tkv) additive mask

    # Online-softmax accumulation, one head at a time (lane slices of the flat
    # (.., D) layout; no head-split relayout needed anywhere).
    for h in range(n_heads):
        qh = q[:, h * dk:(h + 1) * dk]              # (tq,  dk)
        kh = k[:, h * dk:(h + 1) * dk]              # (tkv, dk)
        vh = v[:, h * dk:(h + 1) * dk]              # (tkv, dk)
        s = jax.lax.dot_general(qh, kh, (((1,), (1,)), ((), ())),
                                preferred_element_type=jnp.float32)  # (tq,tkv)
        s = s + bias
        m_prev = m_sc[h]                                              # (tq,1)
        m_new = jnp.maximum(m_prev, jnp.max(s, axis=-1, keepdims=True))
        alpha = jnp.exp(m_prev - m_new)
        p = jnp.exp(s - m_new)
        l_sc[h] = alpha * l_sc[h] + jnp.sum(p, axis=-1, keepdims=True)
        acc_sc[h] = alpha * acc_sc[h] + jnp.dot(
            p.astype(jnp.bfloat16), vh, preferred_element_type=jnp.float32)
        m_sc[h] = m_new

    @pl.when(ki == nk - 1)
    def _():
        x = x_ref[0].astype(jnp.float32)            # (tq, D) residual stream
        # Head merge + output projection via per-head dot accumulation
        # (no VMEM scratch scatter, no masked stores).
        attn = jnp.zeros_like(x)
        for h in range(n_heads):
            inv_l = pl.reciprocal(l_sc[h], approx=True)          # (tq, 1)
            ctx_h = (acc_sc[h] * inv_l).astype(jnp.bfloat16)     # (tq, dk)
            wo_h = wo_ref[pl.ds(h * dk, dk), :]                  # (dk, D)
            attn = attn + jnp.dot(ctx_h, wo_h,
                                  preferred_element_type=jnp.float32)
        # TODO(synk): dropout inside SublayerConnection skipped (inference / p=0)
        x = x + attn + bo_ref[0]

        # FFN sublayer: x + W2(relu(W1(LayerNorm(x))))
        hh = _layer_norm(x, ln2g_ref[0], ln2b_ref[0])
        f = jnp.dot(hh.astype(jnp.bfloat16), w1_ref[...],
                    preferred_element_type=jnp.float32) + b1_ref[0]
        f = jnp.maximum(f, 0.0)
        f = jnp.dot(f.astype(jnp.bfloat16), w2_ref[...],
                    preferred_element_type=jnp.float32) + b2_ref[0]
        x = x + f

        if apply_final_norm:  # fused Decoder.norm (last layer only)
            x = _layer_norm(x, lnfg_ref[0], lnfb_ref[0])

        o_ref[0] = x.astype(o_ref.dtype)


def _attn_ffn_call(x, qkv, bias, p, norm_g, norm_b, *,
                   n_heads, tq, tkv, apply_final_norm, single):
    B, S, D = x.shape
    dk = D // n_heads
    kernel = functools.partial(attn_ffn_kernel, n_heads=n_heads,
                               apply_final_norm=apply_final_norm)
    in_specs = [
        pl.BlockSpec((1, tq, D), lambda b, q, k: (b, q, 0)),    # x residual
        pl.BlockSpec((1, tq, D), lambda b, q, k: (b, q, 0)),    # qkv -> Q cols
        pl.BlockSpec((1, tkv, D), lambda b, q, k: (b, k, 1)),   # qkv -> K cols
        pl.BlockSpec((1, tkv, D), lambda b, q, k: (b, k, 2)),   # qkv -> V cols
        pl.BlockSpec((1, tq, tkv), lambda b, q, k: (b, q, k)),  # additive mask
        _wspec(p["wo"].shape, single), _wspec(p["bo"].shape, single),
        _wspec(p["ln2_g"].shape, single), _wspec(p["ln2_b"].shape, single),
        _wspec(p["w1"].shape, single), _wspec(p["b1"].shape, single),
        _wspec(p["w2"].shape, single), _wspec(p["b2"].shape, single),
        _wspec(norm_g.shape, single), _wspec(norm_b.shape, single),
    ]
    return pl.pallas_call(
        kernel,
        out_shape=jax.ShapeDtypeStruct((B, S, D), x.dtype),
        grid=(B, S // tq, S // tkv),
        in_specs=in_specs,
        out_specs=pl.BlockSpec((1, tq, D), lambda b, q, k: (b, q, 0)),
        scratch_shapes=[pltpu.VMEM((n_heads, tq, 1), jnp.float32),   # m
                        pltpu.VMEM((n_heads, tq, 1), jnp.float32),   # l
                        pltpu.VMEM((n_heads, tq, dk), jnp.float32)], # acc
        compiler_params=pltpu.CompilerParams(
            dimension_semantics=("parallel", "parallel", "arbitrary"),
            vmem_limit_bytes=_VMEM_LIMIT),
    )(x, qkv, qkv, qkv, bias, p["wo"], p["bo"], p["ln2_g"], p["ln2_b"],
      p["w1"], p["b1"], p["w2"], p["b2"], norm_g, norm_b)


def attn_ffn(x, qkv, bias, p, norm_g, norm_b, *,
             n_heads, tq, tkv, apply_final_norm):
    if _SINGLE_BUFFER_OK[0]:
        try:
            return _attn_ffn_call(x, qkv, bias, p, norm_g, norm_b,
                                  n_heads=n_heads, tq=tq, tkv=tkv,
                                  apply_final_norm=apply_final_norm, single=True)
        except Exception:
            _SINGLE_BUFFER_OK[0] = False
    return _attn_ffn_call(x, qkv, bias, p, norm_g, norm_b,
                          n_heads=n_heads, tq=tq, tkv=tkv,
                          apply_final_norm=apply_final_norm, single=False)


# --------------------------------------------------------------------------
# Decoder.forward
# --------------------------------------------------------------------------
def decoder_forward(x, mask, params, n_heads, *, q_tile=None, kv_tile=None):
    """Run all decoder layers (with tgt_mask); final LayerNorm fused into the
    last layer's kernel."""
    B, S, D = x.shape
    if mask.ndim == 4:  # accept (B, 1, S, S)
        mask = mask[:, 0]
    dff = params["layers"][0]["w1"].shape[1]
    tq, tkv = _choose_tiles(S, D, dff, n_heads, _VMEM_LIMIT)
    if q_tile is not None:
        tq = q_tile
    if kv_tile is not None:
        tkv = kv_tile
    ts = _pick_tile(S, 512)

    # One-time mask -> additive bf16 bias (0 / -1e9), reused by every layer.
    bias = jnp.where(mask == 0, -1e9, 0.0).astype(jnp.bfloat16)

    n_layers = len(params["layers"])
    for li, lp in enumerate(params["layers"]):
        qkv = ln_qkv(x, lp["ln1_g"], lp["ln1_b"], lp["wqkv"], lp["bqkv"], ts=ts)
        x = attn_ffn(x, qkv, bias, lp, params["norm_g"], params["norm_b"],
                     n_heads=n_heads, tq=tq, tkv=tkv,
                     apply_final_norm=(li == n_layers - 1))
    return x


def init_params(key, n_layers, d_model, d_ff, n_heads):
    dk = d_model // n_heads
    q_scale = 1.0 / (dk ** 0.5)  # folded into the Q columns of wqkv / bqkv

    def linear(k, din, dout):
        kw, kb = jax.random.split(k)
        w = jax.random.normal(kw, (din, dout), jnp.float32) * (1.0 / jnp.sqrt(din))
        b = jax.random.normal(kb, (1, dout), jnp.float32) * 0.01
        return w, b

    layers = []
    for li in range(n_layers):
        k = jax.random.fold_in(key, li)
        ks = jax.random.split(k, 6)
        wq, bq = linear(ks[0], d_model, d_model)
        wk, bk = linear(ks[1], d_model, d_model)
        wv, bv = linear(ks[2], d_model, d_model)
        wo, bo = linear(ks[3], d_model, d_model)
        w1, b1 = linear(ks[4], d_model, d_ff)
        w2, b2 = linear(ks[5], d_ff, d_model)
        layers.append(dict(
            ln1_g=jnp.ones((1, d_model), jnp.float32),
            ln1_b=jnp.zeros((1, d_model), jnp.float32),
            wqkv=jnp.concatenate([wq * q_scale, wk, wv], axis=1).astype(jnp.bfloat16),
            bqkv=jnp.concatenate([bq * q_scale, bk, bv], axis=1),
            wo=wo.astype(jnp.bfloat16), bo=bo,
            ln2_g=jnp.ones((1, d_model), jnp.float32),
            ln2_b=jnp.zeros((1, d_model), jnp.float32),
            w1=w1.astype(jnp.bfloat16), b1=b1,
            w2=w2.astype(jnp.bfloat16), b2=b2,
        ))
    return dict(layers=layers,
                norm_g=jnp.ones((1, d_model), jnp.float32),
                norm_b=jnp.zeros((1, d_model), jnp.float32))


# --------------------------------------------------------------------------
# Pure-JAX reference (same params / same math) for a tolerance self-check
# --------------------------------------------------------------------------
def decoder_reference(x, mask, params, n_heads):
    B, S, D = x.shape
    dk = D // n_heads
    bias = jnp.where(mask == 0, -1e9, 0.0)

    def ln(h, g, b):
        mu = jnp.mean(h, -1, keepdims=True)
        d = h - mu
        var = jnp.sum(d * d, -1, keepdims=True) / (h.shape[-1] - 1)
        return g * (d / (jnp.sqrt(var) + EPS)) + b

    def heads(t):
        return t.reshape(B, S, n_heads, dk).transpose(0, 2, 1, 3)

    for lp in params["layers"]:
        h = ln(x, lp["ln1_g"][0], lp["ln1_b"][0])
        qkv = h @ lp["wqkv"].astype(jnp.float32) + lp["bqkv"][0]
        q, k, v = jnp.split(qkv, 3, axis=-1)
        qh, kh, vh = heads(q), heads(k), heads(v)
        s = jnp.einsum('bhqd,bhkd->bhqk', qh, kh) + bias[:, None]
        p = jax.nn.softmax(s, axis=-1)
        ctx = jnp.einsum('bhqk,bhkd->bhqd', p, vh)
        ctx = ctx.transpose(0, 2, 1, 3).reshape(B, S, D)
        x = x + ctx @ lp["wo"].astype(jnp.float32) + lp["bo"][0]
        h = ln(x, lp["ln2_g"][0], lp["ln2_b"][0])
        f = jnp.maximum(h @ lp["w1"].astype(jnp.float32) + lp["b1"][0], 0.0)
        x = x + f @ lp["w2"].astype(jnp.float32) + lp["b2"][0]
    return ln(x, params["norm_g"][0], params["norm_b"][0])


if __name__ == "__main__":
    B, S, D = 2, 8, 128
    N_HEADS, D_FF, N_LAYERS = 4, 256, 2

    key = jax.random.PRNGKey(0)
    kx, kp = jax.random.split(key)

    x = jax.random.normal(kx, (B, S, D), jnp.float32)
    # causal (subsequent) target mask, broadcast over batch
    mask = jnp.broadcast_to(jnp.tril(jnp.ones((S, S), jnp.float32)), (B, S, S))

    params = init_params(kp, N_LAYERS, D, D_FF, N_HEADS)

    out = decoder_forward(x, mask, params, N_HEADS)
    out = jax.block_until_ready(out)

    assert out.shape == (B, S, D)
    assert bool(jnp.all(jnp.isfinite(out)))

    ref = decoder_reference(x, mask, params, N_HEADS)
    err = float(jnp.max(jnp.abs(out - ref)))
    assert err < 0.1, f"max abs error vs reference: {err}"
    print("KERNEL_OK")
</pallas_src>

<mosaic_0001>
module attributes {stable_mosaic.version = 11 : i64} {
  func.func @ln_qkv_kernel(%arg0: i32, %arg1: i32, %arg2: memref<1x8x128xf32, #tpu.memory_space<vmem>>, %arg3: memref<1x128xf32, #tpu.memory_space<vmem>>, %arg4: memref<1x128xf32, #tpu.memory_space<vmem>>, %arg5: memref<128x384xbf16, #tpu.memory_space<vmem>>, %arg6: memref<1x384xf32, #tpu.memory_space<vmem>>, %arg7: memref<1x8x384xbf16, #tpu.memory_space<vmem>>) attributes {dimension_semantics = [#tpu.dimension_semantics<parallel>, #tpu.dimension_semantics<parallel>], iteration_bounds = array<i64: 2, 1>, scalar_prefetch = 0 : i64, scratch_operands = 0 : i64, tpu.core_type = #tpu.core_type<tc>, window_params = [{transform_indices = @transform_0, window_bounds = array<i64: 1, 8, 128>}, {pipeline_mode = #tpu.pipeline_mode<synchronous>, transform_indices = @transform_1, window_bounds = array<i64: 1, 128>}, {pipeline_mode = #tpu.pipeline_mode<synchronous>, transform_indices = @transform_2, window_bounds = array<i64: 1, 128>}, {pipeline_mode = #tpu.pipeline_mode<synchronous>, transform_indices = @transform_3, window_bounds = array<i64: 128, 384>}, {pipeline_mode = #tpu.pipeline_mode<synchronous>, transform_indices = @transform_4, window_bounds = array<i64: 1, 384>}, {transform_indices = @transform_5, window_bounds = array<i64: 1, 8, 384>}]} {
    %c0 = arith.constant 0 : index
    %c0_0 = arith.constant 0 : index
    %c0_1 = arith.constant 0 : index
    %0 = vector.load %arg2[%c0, %c0_0, %c0_1] : memref<1x8x128xf32, #tpu.memory_space<vmem>>, vector<1x8x128xf32>
    %1 = vector.shape_cast %0 : vector<1x8x128xf32> to vector<8x128xf32>
    %c0_2 = arith.constant 0 : index
    %c0_3 = arith.constant 0 : index
    %2 = vector.load %arg3[%c0_2, %c0_3] : memref<1x128xf32, #tpu.memory_space<vmem>>, vector<1x128xf32>
    %3 = vector.shape_cast %2 : vector<1x128xf32> to vector<128xf32>
    %c0_4 = arith.constant 0 : index
    %c0_5 = arith.constant 0 : index
    %4 = vector.load %arg4[%c0_4, %c0_5] : memref<1x128xf32, #tpu.memory_space<vmem>>, vector<1x128xf32>
    %5 = vector.shape_cast %4 : vector<1x128xf32> to vector<128xf32>
    %cst = arith.constant dense<0.000000e+00> : vector<8xf32>
    %6 = vector.multi_reduction <add>, %1, %cst [1] : vector<8x128xf32> to vector<8xf32>
    %7 = vector.shape_cast %6 : vector<8xf32> to vector<8x1xf32>
    %cst_6 = arith.constant 1.280000e+02 : f32
    %8 = vector.broadcast %cst_6 : f32 to vector<8x1xf32>
    %9 = arith.divf %7, %8 : vector<8x1xf32>
    %10 = vector.broadcast %9 : vector<8x1xf32> to vector<8x128xf32>
    %11 = arith.subf %1, %10 : vector<8x128xf32>
    %12 = arith.mulf %11, %11 : vector<8x128xf32>
    %cst_7 = arith.constant dense<0.000000e+00> : vector<8xf32>
    %13 = vector.multi_reduction <add>, %12, %cst_7 [1] : vector<8x128xf32> to vector<8xf32>
    %14 = vector.shape_cast %13 : vector<8xf32> to vector<8x1xf32>
    %cst_8 = arith.constant 0.00787401571 : f32
    %15 = vector.broadcast %cst_8 : f32 to vector<8x1xf32>
    %16 = arith.mulf %14, %15 : vector<8x1xf32>
    %17 = math.sqrt %16 : vector<8x1xf32>
    %cst_9 = arith.constant 9.99999997E-7 : f32
    %18 = vector.broadcast %cst_9 : f32 to vector<8x1xf32>
    %19 = arith.addf %17, %18 : vector<8x1xf32>
    %20 = vector.broadcast %19 : vector<8x1xf32> to vector<8x128xf32>
    %21 = arith.divf %11, %20 : vector<8x128xf32>
    %22 = vector.shape_cast %3 : vector<128xf32> to vector<1x128xf32>
    %23 = vector.broadcast %22 : vector<1x128xf32> to vector<8x128xf32>
    %24 = arith.mulf %23, %21 : vector<8x128xf32>
    %25 = vector.shape_cast %5 : vector<128xf32> to vector<1x128xf32>
    %26 = vector.broadcast %25 : vector<1x128xf32> to vector<8x128xf32>
    %27 = arith.addf %24, %26 : vector<8x128xf32>
    %28 = arith.truncf %27 : vector<8x128xf32> to vector<8x128xbf16>
    %c0_10 = arith.constant 0 : index
    %c0_11 = arith.constant 0 : index
    %29 = vector.load %arg5[%c0_10, %c0_11] : memref<128x384xbf16, #tpu.memory_space<vmem>>, vector<128x384xbf16>
    %cst_12 = arith.constant dense<0.000000e+00> : vector<8x384xf32>
    %30 = tpu.matmul %28, %29, %cst_12 {dimension_numbers = #tpu.dot_dimension_numbers<[1], [0], [0], [1], [0, 0, 1, 1], [], []>} : vector<8x128xbf16>, vector<128x384xbf16>, vector<8x384xf32> -> vector<8x384xf32>
    %c0_13 = arith.constant 0 : index
    %c0_14 = arith.constant 0 : index
    %31 = vector.load %arg6[%c0_13, %c0_14] : memref<1x384xf32, #tpu.memory_space<vmem>>, vector<1x384xf32>
    %32 = vector.shape_cast %31 : vector<1x384xf32> to vector<384xf32>
    %33 = vector.shape_cast %32 : vector<384xf32> to vector<1x384xf32>
    %34 = vector.broadcast %33 : vector<1x384xf32> to vector<8x384xf32>
    %35 = arith.addf %30, %34 : vector<8x384xf32>
    %36 = arith.truncf %35 : vector<8x384xf32> to vector<8x384xbf16>
    %c0_15 = arith.constant 0 : index
    %c0_16 = arith.constant 0 : index
    %c0_17 = arith.constant 0 : index
    %37 = vector.load %arg7[%c0_15, %c0_16, %c0_17] : memref<1x8x384xbf16, #tpu.memory_space<vmem>>, vector<1x8x384xbf16>
    %38 = vector.shape_cast %37 : vector<1x8x384xbf16> to vector<8x384xbf16>
    %39 = vector.shape_cast %36 : vector<8x384xbf16> to vector<1x8x384xbf16>
    tpu.vector_store %arg7[%c0_15, %c0_16, %c0_17], %39 {strides = array<i32>} : memref<1x8x384xbf16, #tpu.memory_space<vmem>>, vector<1x8x384xbf16>,
    return
  }
  func.func @transform_0(%arg0: i32, %arg1: i32) -> (i32, i32, i32) {
    %c0_i32 = arith.constant 0 : i32
    %c0_i32_0 = arith.constant 0 : i32
    return %arg0, %arg1, %c0_i32 : i32, i32, i32
  }
  func.func @transform_1(%arg0: i32, %arg1: i32) -> (i32, i32) {
    %c0_i32 = arith.constant 0 : i32
    %c0_i32_0 = arith.constant 0 : i32
    %c0_i32_1 = arith.constant 0 : i32
    return %c0_i32, %c0_i32_0 : i32, i32
  }
  func.func @transform_2(%arg0: i32, %arg1: i32) -> (i32, i32) {
    %c0_i32 = arith.constant 0 : i32
    %c0_i32_0 = arith.constant 0 : i32
    %c0_i32_1 = arith.constant 0 : i32
    return %c0_i32, %c0_i32_0 : i32, i32
  }
  func.func @transform_3(%arg0: i32, %arg1: i32) -> (i32, i32) {
    %c0_i32 = arith.constant 0 : i32
    %c0_i32_0 = arith.constant 0 : i32
    %c0_i32_1 = arith.constant 0 : i32
    return %c0_i32, %c0_i32_0 : i32, i32
  }
  func.func @transform_4(%arg0: i32, %arg1: i32) -> (i32, i32) {
    %c0_i32 = arith.constant 0 : i32
    %c0_i32_0 = arith.constant 0 : i32
    %c0_i32_1 = arith.constant 0 : i32
    return %c0_i32, %c0_i32_0 : i32, i32
  }
  func.func @transform_5(%arg0: i32, %arg1: i32) -> (i32, i32, i32) {
    %c0_i32 = arith.constant 0 : i32
    %c0_i32_0 = arith.constant 0 : i32
    return %arg0, %arg1, %c0_i32 : i32, i32, i32
  }
}

module attributes {stable_mosaic.version = 11 : i64} {
  func.func @ln_qkv_kernel(%arg0: i32, %arg1: i32, %arg2: memref<1x8x128xf32, #tpu.memory_space<vmem>>, %arg3: memref<1x128xf32, #tpu.memory_space<vmem>>, %arg4: memref<1x128xf32, #tpu.memory_space<vmem>>, %arg5: memref<128x384xbf16, #tpu.memory_space<vmem>>, %arg6: memref<1x384xf32, #tpu.memory_space<vmem>>, %arg7: memref<1x8x384xbf16, #tpu.memory_space<vmem>>) attributes {dimension_semantics = [#tpu.dimension_semantics<parallel>, #tpu.dimension_semantics<parallel>], iteration_bounds = array<i64: 2, 1>, scalar_prefetch = 0 : i64, scratch_operands = 0 : i64, tpu.core_type = #tpu.core_type<tc>, window_params = [{transform_indices = @transform_0, window_bounds = array<i64: 1, 8, 128>}, {pipeline_mode = #tpu.pipeline_mode<synchronous>, transform_indices = @transform_1, window_bounds = array<i64: 1, 128>}, {pipeline_mode = #tpu.pipeline_mode<synchronous>, transform_indices = @transform_2, window_bounds = array<i64: 1, 128>}, {pipeline_mode = #tpu.pipeline_mode<synchronous>, transform_indices = @transform_3, window_bounds = array<i64: 128, 384>}, {pipeline_mode = #tpu.pipeline_mode<synchronous>, transform_indices = @transform_4, window_bounds = array<i64: 1, 384>}, {transform_indices = @transform_5, window_bounds = array<i64: 1, 8, 384>}]} {
    %c0 = arith.constant 0 : index
    %c0_0 = arith.constant 0 : index
    %c0_1 = arith.constant 0 : index
    %0 = vector.load %arg2[%c0, %c0_0, %c0_1] : memref<1x8x128xf32, #tpu.memory_space<vmem>>, vector<1x8x128xf32>
    %1 = vector.shape_cast %0 : vector<1x8x128xf32> to vector<8x128xf32>
    %c0_2 = arith.constant 0 : index
    %c0_3 = arith.constant 0 : index
    %2 = vector.load %arg3[%c0_2, %c0_3] : memref<1x128xf32, #tpu.memory_space<vmem>>, vector<1x128xf32>
    %3 = vector.shape_cast %2 : vector<1x128xf32> to vector<128xf32>
    %c0_4 = arith.constant 0 : index
    %c0_5 = arith.constant 0 : index
    %4 = vector.load %arg4[%c0_4, %c0_5] : memref<1x128xf32, #tpu.memory_space<vmem>>, vector<1x128xf32>
    %5 = vector.shape_cast %4 : vector<1x128xf32> to vector<128xf32>
    %cst = arith.constant dense<0.000000e+00> : vector<8xf32>
    %6 = vector.multi_reduction <add>, %1, %cst [1] : vector<8x128xf32> to vector<8xf32>
    %7 = vector.shape_cast %6 : vector<8xf32> to vector<8x1xf32>
    %cst_6 = arith.constant 1.280000e+02 : f32
    %8 = vector.broadcast %cst_6 : f32 to vector<8x1xf32>
    %9 = arith.divf %7, %8 : vector<8x1xf32>
    %10 = vector.broadcast %9 : vector<8x1xf32> to vector<8x128xf32>
    %11 = arith.subf %1, %10 : vector<8x128xf32>
    %12 = arith.mulf %11, %11 : vector<8x128xf32>
    %cst_7 = arith.constant dense<0.000000e+00> : vector<8xf32>
    %13 = vector.multi_reduction <add>, %12, %cst_7 [1] : vector<8x128xf32> to vector<8xf32>
    %14 = vector.shape_cast %13 : vector<8xf32> to vector<8x1xf32>
    %cst_8 = arith.constant 0.00787401571 : f32
    %15 = vector.broadcast %cst_8 : f32 to vector<8x1xf32>
    %16 = arith.mulf %14, %15 : vector<8x1xf32>
    %17 = math.sqrt %16 : vector<8x1xf32>
    %cst_9 = arith.constant 9.99999997E-7 : f32
    %18 = vector.broadcast %cst_9 : f32 to vector<8x1xf32>
    %19 = arith.addf %17, %18 : vector<8x1xf32>
    %20 = vector.broadcast %19 : vector<8x1xf32> to vector<8x128xf32>
    %21 = arith.divf %11, %20 : vector<8x128xf32>
    %22 = vector.shape_cast %3 : vector<128xf32> to vector<1x128xf32>
    %23 = vector.broadcast %22 : vector<1x128xf32> to vector<8x128xf32>
    %24 = arith.mulf %23, %21 : vector<8x128xf32>
    %25 = vector.shape_cast %5 : vector<128xf32> to vector<1x128xf32>
    %26 = vector.broadcast %25 : vector<1x128xf32> to vector<8x128xf32>
    %27 = arith.addf %24, %26 : vector<8x128xf32>
    %28 = arith.truncf %27 : vector<8x128xf32> to vector<8x128xbf16>
    %c0_10 = arith.constant 0 : index
    %c0_11 = arith.constant 0 : index
    %29 = vector.load %arg5[%c0_10, %c0_11] : memref<128x384xbf16, #tpu.memory_space<vmem>>, vector<128x384xbf16>
    %cst_12 = arith.constant dense<0.000000e+00> : vector<8x384xf32>
    %30 = tpu.matmul %28, %29, %cst_12 {dimension_numbers = #tpu.dot_dimension_numbers<[1], [0], [0], [1], [0, 0, 1, 1], [], []>} : vector<8x128xbf16>, vector<128x384xbf16>, vector<8x384xf32> -> vector<8x384xf32>
    %c0_13 = arith.constant 0 : index
    %c0_14 = arith.constant 0 : index
    %31 = vector.load %arg6[%c0_13, %c0_14] : memref<1x384xf32, #tpu.memory_space<vmem>>, vector<1x384xf32>
    %32 = vector.shape_cast %31 : vector<1x384xf32> to vector<384xf32>
    %33 = vector.shape_cast %32 : vector<384xf32> to vector<1x384xf32>
    %34 = vector.broadcast %33 : vector<1x384xf32> to vector<8x384xf32>
    %35 = arith.addf %30, %34 : vector<8x384xf32>
    %36 = arith.truncf %35 : vector<8x384xf32> to vector<8x384xbf16>
    %c0_15 = arith.constant 0 : index
    %c0_16 = arith.constant 0 : index
    %c0_17 = arith.constant 0 : index
    %37 = vector.load %arg7[%c0_15, %c0_16, %c0_17] : memref<1x8x384xbf16, #tpu.memory_space<vmem>>, vector<1x8x384xbf16>
    %38 = vector.shape_cast %37 : vector<1x8x384xbf16> to vector<8x384xbf16>
    %39 = vector.shape_cast %36 : vector<8x384xbf16> to vector<1x8x384xbf16>
    tpu.vector_store %arg7[%c0_15, %c0_16, %c0_17], %39 {strides = array<i32>} : memref<1x8x384xbf16, #tpu.memory_space<vmem>>, vector<1x8x384xbf16>,
    return
  }
  func.func @transform_0(%arg0: i32, %arg1: i32) -> (i32, i32, i32) {
    %c0_i32 = arith.constant 0 : i32
    %c0_i32_0 = arith.constant 0 : i32
    return %arg0, %arg1, %c0_i32 : i32, i32, i32
  }
  func.func @transform_1(%arg0: i32, %arg1: i32) -> (i32, i32) {
    %c0_i32 = arith.constant 0 : i32
    %c0_i32_0 = arith.constant 0 : i32
    %c0_i32_1 = arith.constant 0 : i32
    return %c0_i32, %c0_i32_0 : i32, i32
  }
  func.func @transform_2(%arg0: i32, %arg1: i32) -> (i32, i32) {
    %c0_i32 = arith.constant 0 : i32
    %c0_i32_0 = arith.constant 0 : i32
    %c0_i32_1 = arith.constant 0 : i32
    return %c0_i32, %c0_i32_0 : i32, i32
  }
  func.func @transform_3(%arg0: i32, %arg1: i32) -> (i32, i32) {
    %c0_i32 = arith.constant 0 : i32
    %c0_i32_0 = arith.constant 0 : i32
    %c0_i32_1 = arith.constant 0 : i32
    return %c0_i32, %c0_i32_0 : i32, i32
  }
  func.func @transform_4(%arg0: i32, %arg1: i32) -> (i32, i32) {
    %c0_i32 = arith.constant 0 : i32
    %c0_i32_0 = arith.constant 0 : i32
    %c0_i32_1 = arith.constant 0 : i32
    return %c0_i32, %c0_i32_0 : i32, i32
  }
  func.func @transform_5(%arg0: i32, %arg1: i32) -> (i32, i32, i32) {
    %c0_i32 = arith.constant 0 : i32
    %c0_i32_0 = arith.constant 0 : i32
    return %arg0, %arg1, %c0_i32 : i32, i32, i32
  }
}

</mosaic_0001>

<bundles_post_ra>
// kernel: tpu_custom_call.1
= control target key start
LH: loop header
LB: loop body
LE: loop exit
PB: predicated region body
PF: predicated region fallthrough
CT: control target
= control target key end

     0   :  { %s1252_s0 = inlined_call_operand.hbm [shape: f32[2,8,128], index: 0, kind: input, shape index: {}]   ;;  %s1253_s1 = inlined_call_operand.vmem [shape: f32[1,128], index: 1, kind: input, shape index: {}]   ;;  %s1254_s2 = inlined_call_operand.vmem [shape: f32[1,128], index: 2, kind: input, shape index: {}]   ;;  %s1255_s3 = inlined_call_operand.hbm [shape: bf16[128,384], index: 3, kind: input, shape index: {}]   ;;  %s1256_s4 = inlined_call_operand.vmem [shape: f32[1,384], index: 4, kind: input, shape index: {}]   ;;  %s1257_s5 = inlined_call_operand.hbm [shape: bf16[2,8,384], index: 5, kind: output, shape index: {}]  }
   0x1   :  { %1260 = sst [smem:[#allocation12_spill]] %s1255_s3 }
   0x2   :  { %10 = vsyncpa [#allocation3], 0 }
   0x3   :  { %12 = vsyncpa [#allocation3 + $0x1], 0 }
   0x4   :  { %13 = vsyncpa [#allocation6], 0 }
   0x5   :  { %14 = vsyncpa [#allocation4], 0 }
   0x6   :  { %16 = vsyncpa [#allocation4 + $0x1], 0  ;;  %s1058_s18 = smov 0   ;;  %s1060_s19 = smov 0  }
   0x7   :  { %s1062_s20 = smov 0   ;;  %s1064_s21 = smov 0  }
   0x8   :  { %s1066_s22 = smov 0   ;;  %s1068_s23 = smov 0  }
   0x9 LB: > { %s692_s24 = sadd.s32 4294967295, %s1018_s23   ;;  %s693_s25 = sadd.s32 4294967294, %s1018_s23   ;;  %s1018_s23 = sphi %s1068_s23, %s22_s23   ;;  %s1014_s22 = sphi %s1066_s22, %s1280_s22   ;;  %s1010_s21 = sphi %s1064_s21, %s1279_s21   ;;  %s1006_s20 = sphi %s1062_s20, %s1278_s20   ;;  %s1002_s19 = sphi %s1060_s19, %s1277_s19   ;;  %s998_s18 = sphi %s1058_s18, %s1276_s18  }
   0xa   : > { %p56_p0 = scmp.ne.s32.totalorder %s1002_s19, %s998_s18  ;;  %p1092_p1 = scmp.eq.s32.totalorder %s692_s24, 0 }
   0xb   : > { %p1096_p2 = scmp.eq.s32.totalorder %s692_s24, 1  ;;  %p172_p3 = scmp.eq.s32.totalorder %s693_s25, 1 }
   0xc   : > { %p1102_p4 = por %p1092_p1, %p56_p0  ;;  %p694_p5 = scmp.ge.s32.totalorder %s1018_s23, 1 }
   0xd   : > { %p1107_p6 = por %p172_p3, %p56_p0  ;;  %p179_p7 = scmp.lt.s32.totalorder %s1018_s23, 3 }
   0xe   : > { %s1263_s28 = scalar_select %p1102_p4, 1, 0 }
   0xf   : > { %s1264_s29 = scalar_select %p1107_p6, 1, 0 }
  0x10   : > { %p1112_p8 = pnand %p694_p5, %p179_p7  ;;  %s1020_s6 = smov [#allocation5]  }
  0x11   : > { %s197_s7 = sshll.u32 %s1020_s6, 4  ;;  %s34_s9 = sadd.s32 1, %s1014_s22  ;;  %s198_s7 = int_to_ptr.vmem [resolvable:$true] %s197_s7 }
  0x12   : > { %p774_p9 = pneg %p1112_p8  ;;  %s891_s10 = scalar_lea.vmem %s198_s7, 3072 }
  0x13   : > { %p892_p13 = scmp.ne.s32.totalorder %s198_s7, %s891_s10  ;;  %p899_p5 = scmp.lt.s32.totalorder %s198_s7, %s198_s7 }
  0x14   : > { %p1121_p11 = pnand %p774_p9, %p1092_p1  ;;  %p900_p7 = scmp.lt.s32.totalorder %s891_s10, %s891_s10 }
  0x16   : > { %p882_p12 = pneg %p1121_p11  ;;  %p901_p6 = por %p900_p7, %p899_p5 }
  0x18   : > { %p894_p0 = pnand %p892_p13, %p882_p12 }
  0x1a   : > { %p895_p3 = pneg %p894_p0 }
  0x1c   : > { %p902_p4 = pnand %p901_p6, %p895_p3 }
  0x1e   : > { %905 = shalt.err (!%p902_p4)
}
  0x1f   : > { %s1021_s11 = smov 192   ;;  %s1022_s12 = smov 12  }
  0x20   : > { %s1267_s3 = sld [smem:[#allocation12_spill]]  ;;  %p36_p6 = scmp.ge.s32.totalorder %s34_s9, 2 }
  0x21   : > { %s43_s15 = sadd.s32 1, %s1006_s20  ;;  %p50_p4 = scmp.ne.s32.totalorder %s1006_s20, %s1002_s19 }
  0x22   : > { %p51_p9 = scmp.eq.s32.totalorder %s1018_s23, 0  ;;  %s1282_s9 = smov (%p36_p6, %s34_s9), 0 }
  0x23   : > { %1268 = sst [smem:[#allocation11_spill]] %s1282_s9  ;;  %p1145_p13 = por %p1096_p2, %p50_p4 }
  0x24   : > { %p1139_p12 = por %p51_p9, %p50_p4  ;;  %s38_s24 = ssub.s32 %s1014_s22, %s1282_s9 }
  0x25   : > { %p787_p0 = scmp.lt.s32.totalorder %s1018_s23, 2  ;;  %s214_s25 = sand.u32 1, %s1006_s20  }
  0x26   : > { %777 = dma.hbm_to_vmem [thread:$0]  (!%p1121_p11), %s1267_s3, 3072, %s198_s7, [#allocation6], %s1021_s11, %s1021_s11, %s1022_s12  }
  0x27   : > { %p41_p11 = scmp.eq.s32.totalorder %s38_s24, 0  ;;  %s697_s6 = sshll.u32 %s214_s25, 3 }
  0x28   : > { %s698_s8 = sshll.u32 %s1014_s22, 7  ;;  %s218_s13 = scalar_lea.vmem [#allocation2], %s697_s6 }
  0x29   : > { %s1154_s7 = scalar_select %p41_p11, %s1006_s20, %s43_s15  }
  0x2a   : > { %s224_s12 = scalar_lea.hbm %s1252_s0, %s698_s8  ;;  %s226_s14 = sshll.u32 %s218_s13, 4  ;;  %s227_s14 = int_to_ptr.vmem [resolvable:$true] %s226_s14 }
  0x2b   : > { %p1162_p2 = pnand %p787_p0, %p1139_p12  ;;  %s215_s3 = scalar_lea.sflag [#allocation3], %s214_s25 }
  0x2c   : > { %s919_s24 = scalar_lea.vmem %s227_s14, 128  ;;  %s1023_s15 = smov [#allocation2]  }
  0x2d   : > { %p908_p3 = pneg %p1162_p2  ;;  %p920_p5 = scmp.ne.s32.totalorder %s227_s14, %s919_s24 }
  0x2e   : > { %s924_s9 = sshll.u32 %s1023_s15, 4  ;;  %s925_s9 = int_to_ptr.vmem [resolvable:$false] %s924_s9 }
  0x2f   : > { %p922_p7 = pnand %p920_p5, %p908_p3  ;;  %s926_s8 = scalar_lea.vmem %s925_s9, 256 }
  0x30   : > { %p927_p4 = scmp.lt.s32.totalorder %s227_s14, %s925_s9  ;;  %p928_p9 = scmp.lt.s32.totalorder %s926_s8, %s919_s24 }
  0x31   : > { %p923_p6 = pneg %p922_p7 }
  0x32   : > { %p929_p11 = por %p928_p9, %p927_p4 }
  0x34   : > { %p930_p10 = pnand %p929_p11, %p923_p6 }
  0x36   : > { %933 = shalt.err (!%p930_p10)
}
  0x37   : > { %781 = dma.hbm_to_vmem [thread:$0]  (!%p1162_p2), %s224_s12, 128, %s227_s14, %s215_s3  }
  0x38   : > { %235 = sbr.rel (%p1112_p8) target bundleno = 603 (0x25b), region = 40  ;;  %s1173_s16 = sand.u32 (!%p1112_p8), 1, %s1002_s19  }
  0x39   : > { %s700_s25 = sshll.u32 (!%p1112_p8), %s1173_s16, 3  ;;  %s238_s6 = scalar_lea.sflag (!%p1112_p8), [#allocation3], %s1173_s16 }
  0x3a   : > { %s241_s10 = scalar_lea.vmem (!%p1112_p8), [#allocation2], %s700_s25  ;;  %p1272_p12 = scmp.ne.s32.totalorder (!%p1112_p8), %s1263_s28, 0 }
  0x3d   : > { %985 = dma.done.wait (%p1272_p12), %s238_s6, 128  }
  0x3e   : > { %987 = vsyncadd (%p1272_p12), %s238_s6, 4294967168 }
  0x3f   : > { %989 = dma.done.wait (%p1092_p1), [#allocation6], 3072  }
  0x40   : > { %991 = vsyncadd (%p1092_p1), [#allocation6], 4294964224  ;;  %v273_v0 = vld [vmem:[%s241_s10] sm:$0xff]  ;;  %v1024_v8 = vmov 0.0   ;;  %v855_v14 = vld [vmem:[#allocation5 + $0x80] ss:$12 sps:$4 sm:$0xff]   ;;  %v344_v46 = vlaneseq }
  0x41   : > { %276 = vadd.xlane.f32.xlu0 %v273_v0  ;;  %v844_v5 = vld [vmem:[#allocation5 + $0xac] ss:$12 sps:$4 sm:$0xff]   ;;  %v846_v6 = vld [vmem:[#allocation5 + $0xa8] ss:$12 sps:$4 sm:$0xff]   ;;  %v847_v7 = vld [vmem:[#allocation5 + $0xb0] ss:$12 sps:$4 sm:$0xff]   ;;  %744 = vmatprep.subr.bf16.mxu1 %v1024_v8 }
  0x42   : > { %487 = vmatprep.subr.bf16.mxu0 %v844_v5  ;;  %745 = vmatpush3.bf16.msra.mxu1 %v847_v7  ;;  %v848_v9 = vld [vmem:[#allocation5 + $0x94] ss:$12 sps:$4 sm:$0xff]   ;;  %v850_v10 = vld [vmem:[#allocation5 + $0x90] ss:$12 sps:$4 sm:$0xff]   ;;  %v851_v11 = vld [vmem:[#allocation5 + $0x98] ss:$12 sps:$4 sm:$0xff]  }
  0x43   : > { %488 = vmatpush1.bf16.msra.mxu0 %v846_v6  ;;  %746 = vmatprep.subr.bf16.mxu1 %v1024_v8  ;;  %v852_v12 = vld [vmem:[#allocation5 + $0x7c] ss:$12 sps:$4 sm:$0xff]   ;;  %v854_v13 = vld [vmem:[#allocation5 + $0x78] ss:$12 sps:$4 sm:$0xff]   ;;  %v858_v16 = vld [vmem:[#allocation5 + $0x60] ss:$12 sps:$4 sm:$0xff]  }
  0x44   : > { %489 = vmatprep.subr.bf16.mxu0 %v848_v9  ;;  %v856_v15 = vld [vmem:[#allocation5 + $0x64] ss:$12 sps:$4 sm:$0xff]   ;;  %v859_v17 = vld [vmem:[#allocation5 + $0x68] ss:$12 sps:$4 sm:$0xff]   ;;  %v860_v18 = vld [vmem:[#allocation5 + $0x4c] ss:$12 sps:$4 sm:$0xff]  }
  0x45   : > { %v862_v19 = vld [vmem:[#allocation5 + $0x48] ss:$12 sps:$4 sm:$0xff]   ;;  %v863_v20 = vld [vmem:[#allocation5 + $0x50] ss:$12 sps:$4 sm:$0xff]   ;;  %v1025_v22 = vmov 0   ;;  %vm1026_vm0 = vmmov 0  }
  0x46   : > { %747 = vmatpush3.bf16.msra.mxu1 %v851_v11  ;;  %v864_v21 = vld [vmem:[#allocation5 + $0x34] ss:$12 sps:$4 sm:$0xff]   ;;  %519 = vmatprep.mubr.bf16.mxu0 %v1025_v22  ;;  %v866_v23 = vld [vmem:[#allocation5 + $0x30] ss:$12 sps:$4 sm:$0xff]   ;;  %v867_v24 = vld [vmem:[#allocation5 + $0x38] ss:$12 sps:$4 sm:$0xff]  }
  0x47   : > { %490 = vmatpush1.bf16.msra.mxu0 %v850_v10  ;;  %748 = vmatprep.subr.bf16.mxu1 %v1024_v8  ;;  %v868_v25 = vld [vmem:[#allocation5 + $0x1c] ss:$12 sps:$4 sm:$0xff]   ;;  %v870_v26 = vld [vmem:[#allocation5 + $0x18] ss:$12 sps:$4 sm:$0xff]   ;;  %v871_v27 = vld [vmem:[#allocation5 + $0x20] ss:$12 sps:$4 sm:$0xff]  }
  0x48   : > { %491 = vmatprep.subr.bf16.mxu0 %v852_v12  ;;  %760 = vmatprep.mubr.msk.bf16.mxu1 %vm1026_vm0, %v1024_v8  ;;  %v872_v28 = vld [vmem:[#allocation5 + $0x4] ss:$12 sps:$4 sm:$0xff]   ;;  %v874_v29 = vld [vmem:[#allocation5] ss:$12 sps:$4 sm:$0xff]   ;;  %v875_v30 = vld [vmem:[#allocation5 + $0x8] ss:$12 sps:$4 sm:$0xff]  }
  0x49   : > { %v702_v40 = vld [vmem:[%s1253_s1] ss:$0 sm:$0xff]  ;;  %v345_v47 = vshrl.u32 %v344_v46, 7  ;;  %s764_s12 = smul.u32 12, %s1173_s16  ;;  %s1027_s6 = smov [#allocation7]  }
  0x4a   : > { %749 = vmatpush3.bf16.msra.mxu1 %v855_v14  ;;  %v703_v42 = vld [vmem:[%s1254_s2] ss:$0 sm:$0xff]  ;;  %s765_s13 = smul.u32 192, %s1010_s21  ;;  %s584_s21 = scalar_lea.sflag [#allocation4], %s1173_s16 }
  0x4b   : > { %492 = vmatpush1.bf16.msra.mxu0 %v854_v13  ;;  %750 = vmatprep.subr.bf16.mxu1 %v1024_v8  ;;  %v354_v48 = vsub.s32 2, %v345_v47  ;;  %v342_v49 = vld [vmem:[%s1256_s4] sm:$0x7]  ;;  %v346_v50 = vsub.s32 0, %v345_v47  ;;  %v350_v51 = vsub.s32 1, %v345_v47  ;;  %s271_s14 = scalar_lea.vmem [#allocation7], %s764_s12 }
  0x4c   : > { %493 = vmatprep.subr.bf16.mxu0 %v856_v15  ;;  %s600_s27 = sshll.u32 %s271_s14, 4  ;;  %s1204_s8 = scalar_lea.hbm %s1257_s5, %s765_s13  ;;  %s1206_s27 = int_to_ptr.vmem [resolvable:$true] %s600_s27 }
  0x4d   : > { %v355_v52 = vrot.slane %v342_v49, %v354_v48  ;;  %v347_v53 = vrot.slane %v342_v49, %v346_v50  ;;  %v351_v54 = vrot.slane %v342_v49, %v350_v51  ;;  %s934_s25 = scalar_lea.vmem %s1206_s27, 192  ;;  %s938_s10 = sshll.u32 %s1027_s6, 4  ;;  %s939_s10 = int_to_ptr.vmem [resolvable:$false] %s938_s10 }
  0x4e   : > { %751 = vmatpush3.bf16.msra.mxu1 %v859_v17  ;;  %p935_p1 = scmp.ne.s32.totalorder %s1206_s27, %s934_s25  ;;  %s940_s3 = scalar_lea.vmem %s939_s10, 384 }
  0x4f   : > { %494 = vmatpush1.bf16.msra.mxu0 %v858_v16  ;;  %752 = vmatprep.subr.bf16.mxu1 %v1024_v8  ;;  %p941_p0 = scmp.lt.s32.totalorder %s1206_s27, %s939_s10  ;;  %p942_p2 = scmp.lt.s32.totalorder %s940_s3, %s934_s25 }
  0x50   : > { %495 = vmatprep.subr.bf16.mxu0 %v860_v18  ;;  %p936_p8 = pnand %p935_p1, %p1145_p13 }
  0x51   : > { %p943_p3 = por %p942_p2, %p941_p0 }
  0x52   : > { %753 = vmatpush3.bf16.msra.mxu1 %v863_v20  ;;  %p937_p10 = pneg %p936_p8 }
  0x53   : > { %496 = vmatpush1.bf16.msra.mxu0 %v862_v19  ;;  %754 = vmatprep.subr.bf16.mxu1 %v1024_v8 }
  0x54   : > { %497 = vmatprep.subr.bf16.mxu0 %v864_v21  ;;  %p944_p5 = pnand %p943_p3, %p937_p10 }
  0x56   : > { %755 = vmatpush3.bf16.msra.mxu1 %v867_v24 }
  0x57   : > { %498 = vmatpush1.bf16.msra.mxu0 %v866_v23  ;;  %756 = vmatprep.subr.bf16.mxu1 %v1024_v8 }
  0x58   : > { %499 = vmatprep.subr.bf16.mxu0 %v868_v25 }
  0x5a   : > { %757 = vmatpush3.bf16.msra.mxu1 %v871_v27 }
  0x5b   : > { %500 = vmatpush1.bf16.msra.mxu0 %v870_v26  ;;  %758 = vmatprep.subr.bf16.mxu1 %v1024_v8 }
  0x5c   : > { %501 = vmatprep.subr.bf16.mxu0 %v872_v28 }
  0x5e   : > { %759 = vmatpush3.bf16.msra.mxu1 %v875_v30 }
  0x5f   : > { %502 = vmatpush1.bf16.msra.mxu0 %v874_v29 }
  0xca   : > { %v277_v1 = vpop.xlane.xlu0 %276 }
  0xcb   : > { %v279_v2 = vmul.f32 0.0078125, %v277_v1 }
  0xcd   : > { %v1185_v3 = vsub.f32 %v273_v0, %v279_v2 }
  0xcf   : > { %v281_v4 = vmul.f32 %v1185_v3, %v1185_v3 }
  0xd1   : > { %282 = vadd.xlane.f32.xlu0 %v281_v4 }
 0x15a   : > { %v283_v31 = vpop.xlane.xlu0 %282 }
 0x15b   : > { %v284_v32 = vmul.f32 0.007874016, %v283_v31 }
 0x15d   : > { %876 = vrsqrt.f32 %v284_v32  ;;  %vm287_vm1 = vcmp.eq.f32.partialorder %v284_v32, inf  ;;  %v290_v35 = vand.u32 2147483648, %v284_v32  ;;  %vm289_vm2 = vcmp.eq.f32.partialorder %v284_v32, 0.0 }
 0x16a   : > { %v877_v33 = vpop.eup %876 }
 0x16b   : > { %v286_v34 = vmul.f32 %v877_v33, %v284_v32 }
 0x16d   : > { %v288_v36 = vsel %vm287_vm1, %v284_v32, %v286_v34 }
 0x16e   : > { %v291_v37 = vsel %vm289_vm2, %v290_v35, %v288_v36 }
 0x16f   : > { %v292_v38 = vadd.f32 1e-06, %v291_v37 }
 0x171   : > { %878 = vrcp.f32 %v292_v38 }
 0x17e   : > { %v879_v39 = vpop.eup %878 }
 0x17f   : > { %v294_v41 = vmul.f32 %v879_v39, %v1185_v3 }
 0x181   : > { %v301_v43 = vmul.f32 %v702_v40, %v294_v41 }
 0x183   : > { %v308_v44 = vadd.f32 %v703_v42, %v301_v43 }
 0x185   : > { %v309_v45 = vpack.c.bf16 %v308_v44, %v308_v44 }
 0x187   : > { %520 = vmatmul.mubr.bf16.vlgmr.msra.gmra.mxu0 %v309_v45  ;;  %761 = vmatmul.mubr.bf16.vlgmr.msra.gmra.mxu1 %v309_v45 }
 0x247   : > { %v521_v55 = vpop.f32.mrf.mxu0  ;;  %v562_v56 = vpop.f32.mrf.mxu1 }
 0x248   : > { %v563_v57 = vadd.f32 %v562_v56, %v355_v52  ;;  %v522_v60 = vadd.f32 %v521_v55, %v347_v53 }
 0x249   : > { %v523_v58 = vpop.f32.mrf.mxu0  ;;  %v762_v59 = vpop.f32.mrf.mxu1 }
 0x24a   : > { %v734_v61 = vpack.c.bf16 %v563_v57, %v563_v57  ;;  %v524_v62 = vadd.f32 %v523_v58, %v351_v54 }
 0x24b   : > { %v525_v63 = vpop.f32.mrf.mxu0  ;;  %v565_v0 = vpop.f32.mrf.mxu1 }
 0x24c   : > { %582 = vst [vmem:[%s271_s14 + $0x8] sm:$0xf] %v734_v61  ;;  %v733_v1 = vpack.c.bf16 %v524_v62, %v522_v60 }
 0x24d   : > { %v526_v2 = vpop.f32.mrf.mxu0  ;;  %v763_v3 = vpop.f32.mrf.mxu1 }
 0x24e   : > { %581 = vst [vmem:[%s271_s14] sm:$0xff] %v733_v1 }
 0x24f   : > { %947 = shalt.err (!%p944_p5)
}
 0x250   : > { %s948_s26 = scalar_lea.hbm %s1204_s8, 192  ;;  %s952_s30 = scalar_lea.hbm %s1257_s5, 384 }
 0x251   : > { %p949_p7 = scmp.ne.s32.totalorder %s1204_s8, %s948_s26  ;;  %p953_p9 = scmp.lt.s32.totalorder %s1204_s8, %s1257_s5 }
 0x252   : > { %p954_p11 = scmp.lt.s32.totalorder %s952_s30, %s948_s26 }
 0x253   : > { %p950_p6 = pnand %p949_p7, %p1145_p13 }
 0x254   : > { %p955_p12 = por %p954_p11, %p953_p9 }
 0x255   : > { %p951_p4 = pneg %p950_p6 }
 0x257   : > { %p956_p1 = pnand %p955_p12, %p951_p4 }
 0x259   : > { %959 = shalt.err (!%p956_p1)
}
 0x25a   : > { %772 = dma.vmem_to_hbm [thread:$0]  (%p1145_p13), %s1206_s27, 192, %s1204_s8, %s584_s21  }
 0x25b PF: > { %s612_s12 = sand.u32 1, %s998_s18   ;;  %p1273_p8 = scmp.ne.s32.totalorder %s1264_s29, 0 }
 0x25c   : > { %p1274_p10 = scmp.ge.s32.totalorder %s1018_s23, 2  ;;  %s613_s13 = scalar_lea.sflag [#allocation4], %s612_s12 }
 0x25e   : > { %p783_p0 = pnand %p1274_p10, %p1273_p8 }
 0x260   : > { %p784_p2 = pneg %p783_p0 }
 0x262   : > { %993 = dma.done.wait (%p784_p2), %s613_s13, 192  }
 0x263   : > { %995 = vsyncadd (%p784_p2), %s613_s13, 4294967104  ;;  %s22_s23 = sadd.s32 1, %s1018_s23   ;;  %s1275_s17 = sld [smem:[#allocation11_spill]] }
 0x264   : > { %p19_p3 = scmp.ge.s32.totalorder %s22_s23, 4   ;;  %s1276_s18 = smov %s1002_s19 }
 0x265   : > { %s1277_s19 = smov %s1006_s20  ;;  %s1278_s20 = smov %s1154_s7 }
 0x266   : > { %s1279_s21 = smov %s1014_s22  ;;  %21 = sbr.rel (!%p19_p3) target bundleno = 9 (0x9), region = 89 }
 0x269   : > { %s1280_s22 = smov %s1275_s17 }
 0x26b   :  { %618 = vsyncpa [#allocation3], 1 }
 0x26c   :  { %620 = vsyncpa [#allocation3 + $0x1], 1 }
 0x26d   :  { %621 = vsyncpa [#allocation6], 1 }
 0x26e   :  { %622 = vsyncpa [#allocation4], 1 }
 0x26f   :  { %624 = vsyncpa [#allocation4 + $0x1], 1 }

// kernel: tpu_custom_call.1
= control target key start
LH: loop header
LB: loop body
LE: loop exit
PB: predicated region body
PF: predicated region fallthrough
CT: control target
= control target key end

     0   :  { %s1252_s0 = inlined_call_operand.hbm [shape: f32[2,8,128], index: 0, kind: input, shape index: {}]   ;;  %s1253_s1 = inlined_call_operand.vmem [shape: f32[1,128], index: 1, kind: input, shape index: {}]   ;;  %s1254_s2 = inlined_call_operand.vmem [shape: f32[1,128], index: 2, kind: input, shape index: {}]   ;;  %s1255_s3 = inlined_call_operand.hbm [shape: bf16[128,384], index: 3, kind: input, shape index: {}]   ;;  %s1256_s4 = inlined_call_operand.vmem [shape: f32[1,384], index: 4, kind: input, shape index: {}]   ;;  %s1257_s5 = inlined_call_operand.hbm [shape: bf16[2,8,384], index: 5, kind: output, shape index: {}]  }
   0x1   :  { %1260 = sst [smem:[#allocation12_spill]] %s1255_s3 }
   0x2   :  { %10 = vsyncpa [#allocation3], 0 }
   0x3   :  { %12 = vsyncpa [#allocation3 + $0x1], 0 }
   0x4   :  { %13 = vsyncpa [#allocation6], 0 }
   0x5   :  { %14 = vsyncpa [#allocation4], 0 }
   0x6   :  { %16 = vsyncpa [#allocation4 + $0x1], 0  ;;  %s1058_s18 = smov 0   ;;  %s1060_s19 = smov 0  }
   0x7   :  { %s1062_s20 = smov 0   ;;  %s1064_s21 = smov 0  }
   0x8   :  { %s1066_s22 = smov 0   ;;  %s1068_s23 = smov 0  }
   0x9 LB: > { %s692_s24 = sadd.s32 4294967295, %s1018_s23   ;;  %s693_s25 = sadd.s32 4294967294, %s1018_s23   ;;  %s1018_s23 = sphi %s1068_s23, %s22_s23   ;;  %s1014_s22 = sphi %s1066_s22, %s1280_s22   ;;  %s1010_s21 = sphi %s1064_s21, %s1279_s21   ;;  %s1006_s20 = sphi %s1062_s20, %s1278_s20   ;;  %s1002_s19 = sphi %s1060_s19, %s1277_s19   ;;  %s998_s18 = sphi %s1058_s18, %s1276_s18  }
   0xa   : > { %p56_p0 = scmp.ne.s32.totalorder %s1002_s19, %s998_s18  ;;  %p1092_p1 = scmp.eq.s32.totalorder %s692_s24, 0 }
   0xb   : > { %p1096_p2 = scmp.eq.s32.totalorder %s692_s24, 1  ;;  %p172_p3 = scmp.eq.s32.totalorder %s693_s25, 1 }
   0xc   : > { %p1102_p4 = por %p1092_p1, %p56_p0  ;;  %p694_p5 = scmp.ge.s32.totalorder %s1018_s23, 1 }
   0xd   : > { %p1107_p6 = por %p172_p3, %p56_p0  ;;  %p179_p7 = scmp.lt.s32.totalorder %s1018_s23, 3 }
   0xe   : > { %s1263_s28 = scalar_select %p1102_p4, 1, 0 }
   0xf   : > { %s1264_s29 = scalar_select %p1107_p6, 1, 0 }
  0x10   : > { %p1112_p8 = pnand %p694_p5, %p179_p7  ;;  %s1020_s6 = smov [#allocation5]  }
  0x11   : > { %s197_s7 = sshll.u32 %s1020_s6, 4  ;;  %s34_s9 = sadd.s32 1, %s1014_s22  ;;  %s198_s7 = int_to_ptr.vmem [resolvable:$true] %s197_s7 }
  0x12   : > { %p774_p9 = pneg %p1112_p8  ;;  %s891_s10 = scalar_lea.vmem %s198_s7, 3072 }
  0x13   : > { %p892_p13 = scmp.ne.s32.totalorder %s198_s7, %s891_s10  ;;  %p899_p5 = scmp.lt.s32.totalorder %s198_s7, %s198_s7 }
  0x14   : > { %p1121_p11 = pnand %p774_p9, %p1092_p1  ;;  %p900_p7 = scmp.lt.s32.totalorder %s891_s10, %s891_s10 }
  0x16   : > { %p882_p12 = pneg %p1121_p11  ;;  %p901_p6 = por %p900_p7, %p899_p5 }
  0x18   : > { %p894_p0 = pnand %p892_p13, %p882_p12 }
  0x1a   : > { %p895_p3 = pneg %p894_p0 }
  0x1c   : > { %p902_p4 = pnand %p901_p6, %p895_p3 }
  0x1e   : > { %905 = shalt.err (!%p902_p4)
}
  0x1f   : > { %s1021_s11 = smov 192   ;;  %s1022_s12 = smov 12  }
  0x20   : > { %s1267_s3 = sld [smem:[#allocation12_spill]]  ;;  %p36_p6 = scmp.ge.s32.totalorder %s34_s9, 2 }
  0x21   : > { %s43_s15 = sadd.s32 1, %s1006_s20  ;;  %p50_p4 = scmp.ne.s32.totalorder %s1006_s20, %s1002_s19 }
  0x22   : > { %p51_p9 = scmp.eq.s32.totalorder %s1018_s23, 0  ;;  %s1282_s9 = smov (%p36_p6, %s34_s9), 0 }
  0x23   : > { %1268 = sst [smem:[#allocation11_spill]] %s1282_s9  ;;  %p1145_p13 = por %p1096_p2, %p50_p4 }
  0x24   : > { %p1139_p12 = por %p51_p9, %p50_p4  ;;  %s38_s24 = ssub.s32 %s1014_s22, %s1282_s9 }
  0x25   : > { %p787_p0 = scmp.lt.s32.totalorder %s1018_s23, 2  ;;  %s214_s25 = sand.u32 1, %s1006_s20  }
  0x26   : > { %777 = dma.hbm_to_vmem [thread:$0]  (!%p1121_p11), %s1267_s3, 3072, %s198_s7, [#allocation6], %s1021_s11, %s1021_s11, %s1022_s12  }
  0x27   : > { %p41_p11 = scmp.eq.s32.totalorder %s38_s24, 0  ;;  %s697_s6 = sshll.u32 %s214_s25, 3 }
  0x28   : > { %s698_s8 = sshll.u32 %s1014_s22, 7  ;;  %s218_s13 = scalar_lea.vmem [#allocation2], %s697_s6 }
  0x29   : > { %s1154_s7 = scalar_select %p41_p11, %s1006_s20, %s43_s15  }
  0x2a   : > { %s224_s12 = scalar_lea.hbm %s1252_s0, %s698_s8  ;;  %s226_s14 = sshll.u32 %s218_s13, 4  ;;  %s227_s14 = int_to_ptr.vmem [resolvable:$true] %s226_s14 }
  0x2b   : > { %p1162_p2 = pnand %p787_p0, %p1139_p12  ;;  %s215_s3 = scalar_lea.sflag [#allocation3], %s214_s25 }
  0x2c   : > { %s919_s24 = scalar_lea.vmem %s227_s14, 128  ;;  %s1023_s15 = smov [#allocation2]  }
  0x2d   : > { %p908_p3 = pneg %p1162_p2  ;;  %p920_p5 = scmp.ne.s32.totalorder %s227_s14, %s919_s24 }
  0x2e   : > { %s924_s9 = sshll.u32 %s1023_s15, 4  ;;  %s925_s9 = int_to_ptr.vmem [resolvable:$false] %s924_s9 }
  0x2f   : > { %p922_p7 = pnand %p920_p5, %p908_p3  ;;  %s926_s8 = scalar_lea.vmem %s925_s9, 256 }
  0x30   : > { %p927_p4 = scmp.lt.s32.totalorder %s227_s14, %s925_s9  ;;  %p928_p9 = scmp.lt.s32.totalorder %s926_s8, %s919_s24 }
  0x31   : > { %p923_p6 = pneg %p922_p7 }
  0x32   : > { %p929_p11 = por %p928_p9, %p927_p4 }
  0x34   : > { %p930_p10 = pnand %p929_p11, %p923_p6 }
  0x36   : > { %933 = shalt.err (!%p930_p10)
}
  0x37   : > { %781 = dma.hbm_to_vmem [thread:$0]  (!%p1162_p2), %s224_s12, 128, %s227_s14, %s215_s3  }
  0x38   : > { %235 = sbr.rel (%p1112_p8) target bundleno = 603 (0x25b), region = 40  ;;  %s1173_s16 = sand.u32 (!%p1112_p8), 1, %s1002_s19  }
  0x39   : > { %s700_s25 = sshll.u32 (!%p1112_p8), %s1173_s16, 3  ;;  %s238_s6 = scalar_lea.sflag (!%p1112_p8), [#allocation3], %s1173_s16 }
  0x3a   : > { %s241_s10 = scalar_lea.vmem (!%p1112_p8), [#allocation2], %s700_s25  ;;  %p1272_p12 = scmp.ne.s32.totalorder (!%p1112_p8), %s1263_s28, 0 }
  0x3d   : > { %985 = dma.done.wait (%p1272_p12), %s238_s6, 128  }
  0x3e   : > { %987 = vsyncadd (%p1272_p12), %s238_s6, 4294967168 }
  0x3f   : > { %989 = dma.done.wait (%p1092_p1), [#allocation6], 3072  }
  0x40   : > { %991 = vsyncadd (%p1092_p1), [#allocation6], 4294964224  ;;  %v273_v0 = vld [vmem:[%s241_s10] sm:$0xff]  ;;  %v1024_v8 = vmov 0.0   ;;  %v855_v14 = vld [vmem:[#allocation5 + $0x80] ss:$12 sps:$4 sm:$0xff]   ;;  %v344_v46 = vlaneseq }
  0x41   : > { %276 = vadd.xlane.f32.xlu0 %v273_v0  ;;  %v844_v5 = vld [vmem:[#allocation5 + $0xac] ss:$12 sps:$4 sm:$0xff]   ;;  %v846_v6 = vld [vmem:[#allocation5 + $0xa8] ss:$12 sps:$4 sm:$0xff]   ;;  %v847_v7 = vld [vmem:[#allocation5 + $0xb0] ss:$12 sps:$4 sm:$0xff]   ;;  %744 = vmatprep.subr.bf16.mxu1 %v1024_v8 }
  0x42   : > { %487 = vmatprep.subr.bf16.mxu0 %v844_v5  ;;  %745 = vmatpush3.bf16.msra.mxu1 %v847_v7  ;;  %v848_v9 = vld [vmem:[#allocation5 + $0x94] ss:$12 sps:$4 sm:$0xff]   ;;  %v850_v10 = vld [vmem:[#allocation5 + $0x90] ss:$12 sps:$4 sm:$0xff]   ;;  %v851_v11 = vld [vmem:[#allocation5 + $0x98] ss:$12 sps:$4 sm:$0xff]  }
  0x43   : > { %488 = vmatpush1.bf16.msra.mxu0 %v846_v6  ;;  %746 = vmatprep.subr.bf16.mxu1 %v1024_v8  ;;  %v852_v12 = vld [vmem:[#allocation5 + $0x7c] ss:$12 sps:$4 sm:$0xff]   ;;  %v854_v13 = vld [vmem:[#allocation5 + $0x78] ss:$12 sps:$4 sm:$0xff]   ;;  %v858_v16 = vld [vmem:[#allocation5 + $0x60] ss:$12 sps:$4 sm:$0xff]  }
  0x44   : > { %489 = vmatprep.subr.bf16.mxu0 %v848_v9  ;;  %v856_v15 = vld [vmem:[#allocation5 + $0x64] ss:$12 sps:$4 sm:$0xff]   ;;  %v859_v17 = vld [vmem:[#allocation5 + $0x68] ss:$12 sps:$4 sm:$0xff]   ;;  %v860_v18 = vld [vmem:[#allocation5 + $0x4c] ss:$12 sps:$4 sm:$0xff]  }
  0x45   : > { %v862_v19 = vld [vmem:[#allocation5 + $0x48] ss:$12 sps:$4 sm:$0xff]   ;;  %v863_v20 = vld [vmem:[#allocation5 + $0x50] ss:$12 sps:$4 sm:$0xff]   ;;  %v1025_v22 = vmov 0   ;;  %vm1026_vm0 = vmmov 0  }
  0x46   : > { %747 = vmatpush3.bf16.msra.mxu1 %v851_v11  ;;  %v864_v21 = vld [vmem:[#allocation5 + $0x34] ss:$12 sps:$4 sm:$0xff]   ;;  %519 = vmatprep.mubr.bf16.mxu0 %v1025_v22  ;;  %v866_v23 = vld [vmem:[#allocation5 + $0x30] ss:$12 sps:$4 sm:$0xff]   ;;  %v867_v24 = vld [vmem:[#allocation5 + $0x38] ss:$12 sps:$4 sm:$0xff]  }
  0x47   : > { %490 = vmatpush1.bf16.msra.mxu0 %v850_v10  ;;  %748 = vmatprep.subr.bf16.mxu1 %v1024_v8  ;;  %v868_v25 = vld [vmem:[#allocation5 + $0x1c] ss:$12 sps:$4 sm:$0xff]   ;;  %v870_v26 = vld [vmem:[#allocation5 + $0x18] ss:$12 sps:$4 sm:$0xff]   ;;  %v871_v27 = vld [vmem:[#allocation5 + $0x20] ss:$12 sps:$4 sm:$0xff]  }
  0x48   : > { %491 = vmatprep.subr.bf16.mxu0 %v852_v12  ;;  %760 = vmatprep.mubr.msk.bf16.mxu1 %vm1026_vm0, %v1024_v8  ;;  %v872_v28 = vld [vmem:[#allocation5 + $0x4] ss:$12 sps:$4 sm:$0xff]   ;;  %v874_v29 = vld [vmem:[#allocation5] ss:$12 sps:$4 sm:$0xff]   ;;  %v875_v30 = vld [vmem:[#allocation5 + $0x8] ss:$12 sps:$4 sm:$0xff]  }
  0x49   : > { %v702_v40 = vld [vmem:[%s1253_s1] ss:$0 sm:$0xff]  ;;  %v345_v47 = vshrl.u32 %v344_v46, 7  ;;  %s764_s12 = smul.u32 12, %s1173_s16  ;;  %s1027_s6 = smov [#allocation7]  }
  0x4a   : > { %749 = vmatpush3.bf16.msra.mxu1 %v855_v14  ;;  %v703_v42 = vld [vmem:[%s1254_s2] ss:$0 sm:$0xff]  ;;  %s765_s13 = smul.u32 192, %s1010_s21  ;;  %s584_s21 = scalar_lea.sflag [#allocation4], %s1173_s16 }
  0x4b   : > { %492 = vmatpush1.bf16.msra.mxu0 %v854_v13  ;;  %750 = vmatprep.subr.bf16.mxu1 %v1024_v8  ;;  %v354_v48 = vsub.s32 2, %v345_v47  ;;  %v342_v49 = vld [vmem:[%s1256_s4] sm:$0x7]  ;;  %v346_v50 = vsub.s32 0, %v345_v47  ;;  %v350_v51 = vsub.s32 1, %v345_v47  ;;  %s271_s14 = scalar_lea.vmem [#allocation7], %s764_s12 }
  0x4c   : > { %493 = vmatprep.subr.bf16.mxu0 %v856_v15  ;;  %s600_s27 = sshll.u32 %s271_s14, 4  ;;  %s1204_s8 = scalar_lea.hbm %s1257_s5, %s765_s13  ;;  %s1206_s27 = int_to_ptr.vmem [resolvable:$true] %s600_s27 }
  0x4d   : > { %v355_v52 = vrot.slane %v342_v49, %v354_v48  ;;  %v347_v53 = vrot.slane %v342_v49, %v346_v50  ;;  %v351_v54 = vrot.slane %v342_v49, %v350_v51  ;;  %s934_s25 = scalar_lea.vmem %s1206_s27, 192  ;;  %s938_s10 = sshll.u32 %s1027_s6, 4  ;;  %s939_s10 = int_to_ptr.vmem [resolvable:$false] %s938_s10 }
  0x4e   : > { %751 = vmatpush3.bf16.msra.mxu1 %v859_v17  ;;  %p935_p1 = scmp.ne.s32.totalorder %s1206_s27, %s934_s25  ;;  %s940_s3 = scalar_lea.vmem %s939_s10, 384 }
  0x4f   : > { %494 = vmatpush1.bf16.msra.mxu0 %v858_v16  ;;  %752 = vmatprep.subr.bf16.mxu1 %v1024_v8  ;;  %p941_p0 = scmp.lt.s32.totalorder %s1206_s27, %s939_s10  ;;  %p942_p2 = scmp.lt.s32.totalorder %s940_s3, %s934_s25 }
  0x50   : > { %495 = vmatprep.subr.bf16.mxu0 %v860_v18  ;;  %p936_p8 = pnand %p935_p1, %p1145_p13 }
  0x51   : > { %p943_p3 = por %p942_p2, %p941_p0 }
  0x52   : > { %753 = vmatpush3.bf16.msra.mxu1 %v863_v20  ;;  %p937_p10 = pneg %p936_p8 }
  0x53   : > { %496 = vmatpush1.bf16.msra.mxu0 %v862_v19  ;;  %754 = vmatprep.subr.bf16.mxu1 %v1024_v8 }
  0x54   : > { %497 = vmatprep.subr.bf16.mxu0 %v864_v21  ;;  %p944_p5 = pnand %p943_p3, %p937_p10 }
  0x56   : > { %755 = vmatpush3.bf16.msra.mxu1 %v867_v24 }
  0x57   : > { %498 = vmatpush1.bf16.msra.mxu0 %v866_v23  ;;  %756 = vmatprep.subr.bf16.mxu1 %v1024_v8 }
  0x58   : > { %499 = vmatprep.subr.bf16.mxu0 %v868_v25 }
  0x5a   : > { %757 = vmatpush3.bf16.msra.mxu1 %v871_v27 }
  0x5b   : > { %500 = vmatpush1.bf16.msra.mxu0 %v870_v26  ;;  %758 = vmatprep.subr.bf16.mxu1 %v1024_v8 }
  0x5c   : > { %501 = vmatprep.subr.bf16.mxu0 %v872_v28 }
  0x5e   : > { %759 = vmatpush3.bf16.msra.mxu1 %v875_v30 }
  0x5f   : > { %502 = vmatpush1.bf16.msra.mxu0 %v874_v29 }
  0xca   : > { %v277_v1 = vpop.xlane.xlu0 %276 }
  0xcb   : > { %v279_v2 = vmul.f32 0.0078125, %v277_v1 }
  0xcd   : > { %v1185_v3 = vsub.f32 %v273_v0, %v279_v2 }
  0xcf   : > { %v281_v4 = vmul.f32 %v1185_v3, %v1185_v3 }
  0xd1   : > { %282 = vadd.xlane.f32.xlu0 %v281_v4 }
 0x15a   : > { %v283_v31 = vpop.xlane.xlu0 %282 }
 0x15b   : > { %v284_v32 = vmul.f32 0.007874016, %v283_v31 }
 0x15d   : > { %876 = vrsqrt.f32 %v284_v32  ;;  %vm287_vm1 = vcmp.eq.f32.partialorder %v284_v32, inf  ;;  %v290_v35 = vand.u32 2147483648, %v284_v32  ;;  %vm289_vm2 = vcmp.eq.f32.partialorder %v284_v32, 0.0 }
 0x16a   : > { %v877_v33 = vpop.eup %876 }
 0x16b   : > { %v286_v34 = vmul.f32 %v877_v33, %v284_v32 }
 0x16d   : > { %v288_v36 = vsel %vm287_vm1, %v284_v32, %v286_v34 }
 0x16e   : > { %v291_v37 = vsel %vm289_vm2, %v290_v35, %v288_v36 }
 0x16f   : > { %v292_v38 = vadd.f32 1e-06, %v291_v37 }
 0x171   : > { %878 = vrcp.f32 %v292_v38 }
 0x17e   : > { %v879_v39 = vpop.eup %878 }
 0x17f   : > { %v294_v41 = vmul.f32 %v879_v39, %v1185_v3 }
 0x181   : > { %v301_v43 = vmul.f32 %v702_v40, %v294_v41 }
 0x183   : > { %v308_v44 = vadd.f32 %v703_v42, %v301_v43 }
 0x185   : > { %v309_v45 = vpack.c.bf16 %v308_v44, %v308_v44 }
 0x187   : > { %520 = vmatmul.mubr.bf16.vlgmr.msra.gmra.mxu0 %v309_v45  ;;  %761 = vmatmul.mubr.bf16.vlgmr.msra.gmra.mxu1 %v309_v45 }
 0x247   : > { %v521_v55 = vpop.f32.mrf.mxu0  ;;  %v562_v56 = vpop.f32.mrf.mxu1 }
 0x248   : > { %v563_v57 = vadd.f32 %v562_v56, %v355_v52  ;;  %v522_v60 = vadd.f32 %v521_v55, %v347_v53 }
 0x249   : > { %v523_v58 = vpop.f32.mrf.mxu0  ;;  %v762_v59 = vpop.f32.mrf.mxu1 }
 0x24a   : > { %v734_v61 = vpack.c.bf16 %v563_v57, %v563_v57  ;;  %v524_v62 = vadd.f32 %v523_v58, %v351_v54 }
 0x24b   : > { %v525_v63 = vpop.f32.mrf.mxu0  ;;  %v565_v0 = vpop.f32.mrf.mxu1 }
 0x24c   : > { %582 = vst [vmem:[%s271_s14 + $0x8] sm:$0xf] %v734_v61  ;;  %v733_v1 = vpack.c.bf16 %v524_v62, %v522_v60 }
 0x24d   : > { %v526_v2 = vpop.f32.mrf.mxu0  ;;  %v763_v3 = vpop.f32.mrf.mxu1 }
 0x24e   : > { %581 = vst [vmem:[%s271_s14] sm:$0xff] %v733_v1 }
 0x24f   : > { %947 = shalt.err (!%p944_p5)
}
 0x250   : > { %s948_s26 = scalar_lea.hbm %s1204_s8, 192  ;;  %s952_s30 = scalar_lea.hbm %s1257_s5, 384 }
 0x251   : > { %p949_p7 = scmp.ne.s32.totalorder %s1204_s8, %s948_s26  ;;  %p953_p9 = scmp.lt.s32.totalorder %s1204_s8, %s1257_s5 }
 0x252   : > { %p954_p11 = scmp.lt.s32.totalorder %s952_s30, %s948_s26 }
 0x253   : > { %p950_p6 = pnand %p949_p7, %p1145_p13 }
 0x254   : > { %p955_p12 = por %p954_p11, %p953_p9 }
 0x255   : > { %p951_p4 = pneg %p950_p6 }
 0x257   : > { %p956_p1 = pnand %p955_p12, %p951_p4 }
 0x259   : > { %959 = shalt.err (!%p956_p1)
}
 0x25a   : > { %772 = dma.vmem_to_hbm [thread:$0]  (%p1145_p13), %s1206_s27, 192, %s1204_s8, %s584_s21  }
 0x25b PF: > { %s612_s12 = sand.u32 1, %s998_s18   ;;  %p1273_p8 = scmp.ne.s32.totalorder %s1264_s29, 0 }
 0x25c   : > { %p1274_p10 = scmp.ge.s32.totalorder %s1018_s23, 2  ;;  %s613_s13 = scalar_lea.sflag [#allocation4], %s612_s12 }
 0x25e   : > { %p783_p0 = pnand %p1274_p10, %p1273_p8 }
 0x260   : > { %p784_p2 = pneg %p783_p0 }
 0x262   : > { %993 = dma.done.wait (%p784_p2), %s613_s13, 192  }
 0x263   : > { %995 = vsyncadd (%p784_p2), %s613_s13, 4294967104  ;;  %s22_s23 = sadd.s32 1, %s1018_s23   ;;  %s1275_s17 = sld [smem:[#allocation11_spill]] }
 0x264   : > { %p19_p3 = scmp.ge.s32.totalorder %s22_s23, 4   ;;  %s1276_s18 = smov %s1002_s19 }
 0x265   : > { %s1277_s19 = smov %s1006_s20  ;;  %s1278_s20 = smov %s1154_s7 }
 0x266   : > { %s1279_s21 = smov %s1014_s22  ;;  %21 = sbr.rel (!%p19_p3) target bundleno = 9 (0x9), region = 89 }
 0x269   : > { %s1280_s22 = smov %s1275_s17 }
 0x26b   :  { %618 = vsyncpa [#allocation3], 1 }
 0x26c   :  { %620 = vsyncpa [#allocation3 + $0x1], 1 }
 0x26d   :  { %621 = vsyncpa [#allocation6], 1 }
 0x26e   :  { %622 = vsyncpa [#allocation4], 1 }
 0x26f   :  { %624 = vsyncpa [#allocation4 + $0x1], 1 }

</bundles_post_ra>
